<compile_context>
chip_gen: v7x
topology: tpu7x:2x2x1
jax: 0.10.0
libtpu: 0.0.40
codegen_flags: <defaults>
</compile_context>

<pallas_src>
import functools

import jax
import jax.numpy as jnp
from jax.experimental import pallas as pl
from jax.experimental.pallas import tpu as pltpu

LANES = 128               # vreg lane width (last dim)
SUBLANES = 8              # vreg sublanes for f32 (second-to-last dim)
MAX_FWD_TILE_ROWS = 8192  # 4 MiB f32 per buffer; 2 inputs x 2 bufs = 16 MiB
MAX_BWD_TILE_ROWS = 4096  # 2 MiB f32 per buffer; 3 arrays x 2 bufs = 12 MiB
VMEM_LIMIT_BYTES = 32 * 1024 * 1024  # explicit: > v5e 16 MiB default, < v7x 64 MiB phys


def _cdiv(a, b):
    return -(-a // b)


def _tensorcores_per_chip():
    """2 TensorCores on v7x (worth a 'parallel' core-split), 1 on v5e/v6e."""
    try:
        kind = jax.devices()[0].device_kind.lower()
    except Exception:
        return 1
    return 2 if ("v7" in kind or "tpu7" in kind) else 1


def _fwd_plan(rows, nsplit):
    """Largest power-of-two tile (>= 8 rows) that still gives every split work."""
    tile = MAX_FWD_TILE_ROWS
    while tile > SUBLANES and nsplit * (tile // 2) >= rows:
        tile //= 2
    steps = _cdiv(_cdiv(rows, nsplit), tile)
    return tile, steps


def _bwd_plan(rows):
    tile = MAX_BWD_TILE_ROWS
    while tile > SUBLANES and (tile // 2) >= rows:
        tile //= 2
    return tile


def _as_slab(flat, total, rows):
    """View a flat vector as a lane-dense (rows, 128) slab.

    When total is a multiple of 128 this is a pure reshape (no HBM copy).
    """
    if total == rows * LANES:
        return flat.reshape(rows, LANES)
    # TODO(synk): ragged-lane case (size % 128 != 0) still pays one XLA pad copy.
    return jnp.pad(flat, (0, rows * LANES - total)).reshape(rows, LANES)


# ----------------------------- forward kernel ------------------------------

def _mse_fwd_kernel(x_ref, t_ref, acc_ref, *, rows, tile_rows, steps):
    p = pl.program_id(0)
    i = pl.program_id(1)

    @pl.when(i == 0)
    def _():
        acc_ref[...] = jnp.zeros_like(acc_ref)

    # Mask rows past the (unpadded) end of the slab. row0 is the *intended*
    # (unclamped) global start row of this grid step, so duplicate blocks that
    # were clamped by the index_map contribute exactly zero.
    row0 = (p * steps + i) * tile_rows
    local_row = jax.lax.broadcasted_iota(jnp.int32, (tile_rows, LANES), 0)
    valid = (row0 + local_row) < rows

    # Cast in-kernel so bf16 inputs keep their halved HBM traffic.
    d = x_ref[...].astype(jnp.float32) - t_ref[...].astype(jnp.float32)
    sq = jnp.where(valid, d * d, 0.0)
    # Keep the partial sum vreg-shaped (8,128): only VPU adds in the hot loop.
    # The single cross-lane/sublane reduce happens once, in the wrapper.
    acc_ref[...] += jnp.sum(sq.reshape(-1, SUBLANES, LANES), axis=0)


def _mse_fwd_call(x2d, t2d, total, rows, nsplit, tile_rows, steps):
    nb = _cdiv(rows, tile_rows)  # number of real (possibly ragged) blocks

    def in_map(p, i):
        # Clamp so no DMA reads past the slab; invalid rows are masked in-kernel.
        return (jnp.minimum(p * steps + i, nb - 1), 0)

    block = pl.BlockSpec((tile_rows, LANES), in_map)
    kernel = functools.partial(
        _mse_fwd_kernel, rows=rows, tile_rows=tile_rows, steps=steps)

    partials = pl.pallas_call(
        kernel,
        out_shape=jax.ShapeDtypeStruct((nsplit * SUBLANES, LANES), jnp.float32),
        grid_spec=pltpu.PrefetchScalarGridSpec(
            num_scalar_prefetch=0,
            grid=(nsplit, steps),
            in_specs=[block, block],
            out_specs=pl.BlockSpec((SUBLANES, LANES), lambda p, i: (p, 0)),
        ),
        compiler_params=pltpu.CompilerParams(
            dimension_semantics=("parallel", "arbitrary"),
            vmem_limit_bytes=VMEM_LIMIT_BYTES,
        ),
    )(x2d, t2d)
    return jnp.sum(partials) * (1.0 / float(total))


# ----------------------------- backward kernel -----------------------------

def _mse_bwd_kernel(g_ref, x_ref, t_ref, dx_ref, *, scale):
    d = x_ref[...].astype(jnp.float32) - t_ref[...].astype(jnp.float32)
    dx_ref[...] = (d * (scale * g_ref[0, 0])).astype(dx_ref.dtype)


def _mse_bwd_call(x2d, t2d, g, total, rows, tile_rows):
    nb = _cdiv(rows, tile_rows)
    block = pl.BlockSpec((tile_rows, LANES), lambda i: (i, 0))
    kernel = functools.partial(_mse_bwd_kernel, scale=2.0 / float(total))
    g11 = jnp.asarray(g, dtype=jnp.float32).reshape(1, 1)
    return pl.pallas_call(
        kernel,
        out_shape=jax.ShapeDtypeStruct((rows, LANES), x2d.dtype),
        grid_spec=pltpu.PrefetchScalarGridSpec(
            num_scalar_prefetch=0,
            grid=(nb,),
            in_specs=[
                pl.BlockSpec(memory_space=pltpu.MemorySpace.SMEM),  # scalar g
                block,
                block,
            ],
            out_specs=block,
        ),
        compiler_params=pltpu.CompilerParams(
            dimension_semantics=("parallel",),
            vmem_limit_bytes=VMEM_LIMIT_BYTES,
        ),
    )(g11, x2d, t2d)


# ----------------------------- custom VJP -----------------------------------

def _make_loss_fn(t2d, total, rows, nsplit):
    """Differentiable scalar MSE against a closed-over constant target slab."""
    fwd_tile, fwd_steps = _fwd_plan(rows, nsplit)
    bwd_tile = _bwd_plan(rows)

    @jax.custom_vjp
    def loss2d(x2d):
        return _mse_fwd_call(x2d, t2d, total, rows, nsplit, fwd_tile, fwd_steps)

    def loss2d_fwd(x2d):
        out = _mse_fwd_call(x2d, t2d, total, rows, nsplit, fwd_tile, fwd_steps)
        return out, x2d

    def loss2d_bwd(x2d, g):
        # target is a constant (stop_gradient'd): no target cotangent pass.
        return (_mse_bwd_call(x2d, t2d, g, total, rows, bwd_tile),)

    loss2d.defvjp(loss2d_fwd, loss2d_bwd)
    return loss2d


# ----------------------------- module wrapper -------------------------------

class ContentLossPallas:
    """Pallas equivalent of the PyTorch ContentLoss module."""

    def __init__(self, target, store_target_bf16=False):
        # target is "detached" (a constant) -> flatten / slab it exactly once.
        self.target = jax.lax.stop_gradient(jnp.asarray(target))
        self._total = int(self.target.size)
        self._rows = _cdiv(self._total, LANES)
        self._nsplit = _tensorcores_per_chip()
        t2d = _as_slab(self.target.reshape(-1), self._total, self._rows)
        if store_target_bf16:
            # Optional mem-bound win: halves target HBM traffic (kernels
            # accumulate in f32) at the cost of a tiny loss perturbation.
            t2d = t2d.astype(jnp.bfloat16)
        self._t2d = t2d
        self._loss2d = _make_loss_fn(self._t2d, self._total, self._rows,
                                     self._nsplit)
        self.loss = None

    def loss_fn(self, x):
        """Differentiable scalar MSE loss (use this under jax.jit / jax.grad)."""
        assert x.shape == self.target.shape
        x2d = _as_slab(x.reshape(-1), self._total, self._rows)
        return self._loss2d(x2d)

    def __call__(self, x):
        # NOTE: mutating self.loss is a Python side effect; under jax.jit it
        # becomes a tracer — prefer loss_fn for traced/optimized code paths.
        self.loss = self.loss_fn(x)
        return x  # module passes its input through unchanged


if __name__ == "__main__":
    key = jax.random.PRNGKey(0)
    k1, k2 = jax.random.split(key)

    # Small NCHW feature map, consistent with the style-transfer usage.
    x = jax.random.normal(k1, (2, 4, 16, 16), dtype=jnp.float32)
    target = jax.random.normal(k2, (2, 4, 16, 16), dtype=jnp.float32)

    module = ContentLossPallas(target)
    out = module(x)

    out = jax.block_until_ready(out)
    loss = jax.block_until_ready(module.loss)

    # Forward correctness vs plain-JAX reference (F.mse_loss default = mean).
    ref_loss = jnp.mean((x - target) ** 2)
    assert jnp.allclose(loss, ref_loss, rtol=1e-6, atol=1e-6), (loss, ref_loss)
    assert jnp.array_equal(out, x)

    # Backward correctness (custom VJP through the Pallas kernels).
    dx = jax.block_until_ready(jax.grad(module.loss_fn)(x))
    ref_dx = 2.0 * (x - target) / x.size
    assert jnp.allclose(dx, ref_dx, rtol=1e-5, atol=1e-8), float(
        jnp.max(jnp.abs(dx - ref_dx))
    )

    # Also exercise the intended optimized path (jit).
    loss_j = jax.block_until_ready(jax.jit(module.loss_fn)(x))
    assert jnp.allclose(loss_j, ref_loss, rtol=1e-6, atol=1e-6)

    print("KERNEL_OK")
</pallas_src>

<mosaic_0001>
module attributes {stable_mosaic.version = 11 : i64} {
  func.func @_mse_fwd_kernel(%arg0: i32, %arg1: i32, %arg2: memref<16x128xf32, #tpu.memory_space<vmem>>, %arg3: memref<16x128xf32, #tpu.memory_space<vmem>>, %arg4: memref<8x128xf32, #tpu.memory_space<vmem>>) attributes {dimension_semantics = [#tpu.dimension_semantics<parallel>, #tpu.dimension_semantics<arbitrary>], iteration_bounds = array<i64: 1, 1>, scalar_prefetch = 0 : i64, scratch_operands = 0 : i64, tpu.core_type = #tpu.core_type<tc>, window_params = [{transform_indices = @transform_0, window_bounds = array<i64: 16, 128>}, {transform_indices = @transform_1, window_bounds = array<i64: 16, 128>}, {transform_indices = @transform_2, window_bounds = array<i64: 8, 128>}]} {
    %c0_i32 = arith.constant 0 : i32
    %0 = arith.cmpi eq, %arg1, %c0_i32 : i32
    %1 = arith.extui %0 : i1 to i32
    %c0_i32_0 = arith.constant 0 : i32
    %2 = arith.cmpi ne, %1, %c0_i32_0 : i32
    scf.if %2 {
      %cst_10 = arith.constant 0.000000e+00 : f32
      %22 = vector.broadcast %cst_10 : f32 to vector<8x128xf32>
      %c0_11 = arith.constant 0 : index
      %c0_12 = arith.constant 0 : index
      %23 = vector.load %arg4[%c0_11, %c0_12] : memref<8x128xf32, #tpu.memory_space<vmem>>, vector<8x128xf32>
      tpu.vector_store %arg4[%c0_11, %c0_12], %22 {strides = array<i32>} : memref<8x128xf32, #tpu.memory_space<vmem>>, vector<8x128xf32>,
    } else {
    }
    %c1_i32 = arith.constant 1 : i32
    %3 = arith.muli %arg0, %c1_i32 : i32
    %4 = arith.addi %3, %arg1 : i32
    %c16_i32 = arith.constant 16 : i32
    %5 = arith.muli %4, %c16_i32 : i32
    %6 = tpu.iota {dimensions = array<i32: 0>} : vector<16x128xi32>
    %7 = vector.broadcast %5 : i32 to vector<16x128xi32>
    %8 = arith.addi %7, %6 : vector<16x128xi32>
    %c16_i32_1 = arith.constant 16 : i32
    %9 = vector.broadcast %c16_i32_1 : i32 to vector<16x128xi32>
    %10 = arith.cmpi slt, %8, %9 : vector<16x128xi32>
    %c0 = arith.constant 0 : index
    %c0_2 = arith.constant 0 : index
    %11 = vector.load %arg2[%c0, %c0_2] : memref<16x128xf32, #tpu.memory_space<vmem>>, vector<16x128xf32>
    %c0_3 = arith.constant 0 : index
    %c0_4 = arith.constant 0 : index
    %12 = vector.load %arg3[%c0_3, %c0_4] : memref<16x128xf32, #tpu.memory_space<vmem>>, vector<16x128xf32>
    %13 = arith.subf %11, %12 : vector<16x128xf32>
    %14 = arith.mulf %13, %13 : vector<16x128xf32>
    %cst = arith.constant 0.000000e+00 : f32
    %15 = vector.broadcast %cst : f32 to vector<16x128xf32>
    %16 = arith.select %10, %14, %15 : vector<16x128xi1>, vector<16x128xf32>
    %c0_5 = arith.constant 0 : index
    %c0_6 = arith.constant 0 : index
    %17 = vector.load %arg4[%c0_5, %c0_6] : memref<8x128xf32, #tpu.memory_space<vmem>>, vector<8x128xf32>
    %18 = vector.shape_cast %16 : vector<16x128xf32> to vector<2x8x128xf32>
    %cst_7 = arith.constant dense<0.000000e+00> : vector<8x128xf32>
    %19 = vector.multi_reduction <add>, %18, %cst_7 [0] : vector<2x8x128xf32> to vector<8x128xf32>
    %20 = arith.addf %17, %19 : vector<8x128xf32>
    %c0_8 = arith.constant 0 : index
    %c0_9 = arith.constant 0 : index
    %21 = vector.load %arg4[%c0_8, %c0_9] : memref<8x128xf32, #tpu.memory_space<vmem>>, vector<8x128xf32>
    tpu.vector_store %arg4[%c0_8, %c0_9], %20 {strides = array<i32>} : memref<8x128xf32, #tpu.memory_space<vmem>>, vector<8x128xf32>,
    return
  }
  func.func @transform_0(%arg0: i32, %arg1: i32) -> (i32, i32) {
    %c1_i32 = arith.constant 1 : i32
    %0 = arith.muli %arg0, %c1_i32 : i32
    %1 = arith.addi %0, %arg1 : i32
    %c0_i32 = arith.constant 0 : i32
    %2 = arith.minsi %1, %c0_i32 : i32
    %c0_i32_0 = arith.constant 0 : i32
    %c0_i32_1 = arith.constant 0 : i32
    return %2, %c0_i32_0 : i32, i32
  }
  func.func @transform_1(%arg0: i32, %arg1: i32) -> (i32, i32) {
    %c1_i32 = arith.constant 1 : i32
    %0 = arith.muli %arg0, %c1_i32 : i32
    %1 = arith.addi %0, %arg1 : i32
    %c0_i32 = arith.constant 0 : i32
    %2 = arith.minsi %1, %c0_i32 : i32
    %c0_i32_0 = arith.constant 0 : i32
    %c0_i32_1 = arith.constant 0 : i32
    return %2, %c0_i32_0 : i32, i32
  }
  func.func @transform_2(%arg0: i32, %arg1: i32) -> (i32, i32) {
    %c0_i32 = arith.constant 0 : i32
    %c0_i32_0 = arith.constant 0 : i32
    return %arg0, %c0_i32 : i32, i32
  }
}

</mosaic_0001>

<bundles_post_ra>
// kernel: tpu_custom_call.1
= control target key start
LH: loop header
LB: loop body
LE: loop exit
PB: predicated region body
PF: predicated region fallthrough
CT: control target
= control target key end

     0   :  { %7 = vsyncpa [#allocation3], 0  ;;  %s243_s0 = inlined_call_operand.hbm [shape: f32[16,128], index: 0, kind: input, shape index: {}]   ;;  %s244_s1 = inlined_call_operand.hbm [shape: f32[16,128], index: 1, kind: input, shape index: {}]   ;;  %s245_s2 = inlined_call_operand.hbm [shape: f32[8,128], index: 2, kind: output, shape index: {}]  }
   0x1   :  { %8 = vsyncpa [#allocation6], 0 }
   0x2   :  { %9 = vsyncpa [#allocation4], 0  ;;  %s187_s9 = smov [#allocation2]   ;;  %s115_s13 = scalar_lea.hbm %s243_s0, 256 }
   0x3   :  { %s21_s10 = sshll.u32 %s187_s9, 4  ;;  %p116_p0 = scmp.ne.s32.totalorder %s243_s0, %s115_s13  ;;  %s22_s10 = int_to_ptr.vmem [resolvable:$true] %s21_s10 }
   0x4   :  { %p119_p1 = scmp.lt.u32.totalorder %s115_s13, %s243_s0 }
   0x6   :  { %p121_p2 = pnand %p119_p1, %p116_p0 }
   0x8   :  { %124 = shalt.err (!%p121_p2)
}
   0x9   :  { %s125_s18 = scalar_lea.vmem %s22_s10, 256  ;;  %p130_p4 = scmp.lt.s32.totalorder %s22_s10, %s22_s10 }
   0xa   :  { %p126_p3 = scmp.ne.s32.totalorder %s22_s10, %s125_s18  ;;  %p131_p5 = scmp.lt.s32.totalorder %s125_s18, %s125_s18 }
   0xc   :  { %p132_p6 = por %p131_p5, %p130_p4 }
   0xe   :  { %p133_p7 = pnand %p132_p6, %p126_p3 }
  0x10   :  { %136 = shalt.err (!%p133_p7)
}
  0x11   :  { %s188_s19 = smov 128   ;;  %s189_s20 = smov 8  }
  0x12   :  { %27 = dma.hbm_to_vmem [thread:$0]  %s243_s0, 256, %s22_s10, [#allocation3], %s188_s19, %s188_s19, %s189_s20  }
  0x13   :  { %s190_s23 = smov [#allocation5]   ;;  %s137_s27 = scalar_lea.hbm %s244_s1, 256 }
  0x14   :  { %s39_s24 = sshll.u32 %s190_s23, 4  ;;  %p138_p8 = scmp.ne.s32.totalorder %s244_s1, %s137_s27  ;;  %s40_s24 = int_to_ptr.vmem [resolvable:$true] %s39_s24 }
  0x15   :  { %p141_p9 = scmp.lt.u32.totalorder %s137_s27, %s244_s1 }
  0x17   :  { %p143_p10 = pnand %p141_p9, %p138_p8 }
  0x19   :  { %146 = shalt.err (!%p143_p10)
}
  0x1a   :  { %s147_s4 = scalar_lea.vmem %s40_s24, 256  ;;  %p152_p12 = scmp.lt.s32.totalorder %s40_s24, %s40_s24 }
  0x1b   :  { %p148_p11 = scmp.ne.s32.totalorder %s40_s24, %s147_s4  ;;  %p153_p13 = scmp.lt.s32.totalorder %s147_s4, %s147_s4 }
  0x1d   :  { %p154_p0 = por %p153_p13, %p152_p12 }
  0x1f   :  { %p155_p1 = pnand %p154_p0, %p148_p11 }
  0x21   :  { %158 = shalt.err (!%p155_p1)
}
  0x22   :  { %45 = dma.hbm_to_vmem [thread:$0]  %s244_s1, 256, %s40_s24, [#allocation6], %s188_s19, %s188_s19, %s189_s20  }
  0x23   :  { %181 = dma.done.wait [#allocation3], 256  }
  0x24   :  { %182 = vsyncadd [#allocation3], 4294967040 }
  0x25   :  { %183 = dma.done.wait [#allocation6], 256  }
  0x26   :  { %184 = vsyncadd [#allocation6], 4294967040  ;;  %v75_v0 = vld [vmem:[#allocation2] sm:$0xff]  ;;  %v76_v1 = vld [vmem:[#allocation2 + $0x8] sm:$0xff]  ;;  %s191_s6 = smov [#allocation7]  }
  0x27   :  { %v77_v2 = vld [vmem:[#allocation5] sm:$0xff]  ;;  %v78_v3 = vld [vmem:[#allocation5 + $0x8] sm:$0xff]  ;;  %s95_s7 = sshll.u32 %s191_s6, 4  ;;  %s96_s7 = int_to_ptr.vmem [resolvable:$true] %s95_s7 }
  0x28   :  { %v79_v4 = vsub.f32 %v75_v0, %v77_v2  ;;  %v80_v5 = vsub.f32 %v76_v1, %v78_v3  ;;  %s159_s8 = scalar_lea.vmem %s96_s7, 128  ;;  %p164_p3 = scmp.lt.s32.totalorder %s96_s7, %s96_s7 }
  0x29   :  { %p160_p2 = scmp.ne.s32.totalorder %s96_s7, %s159_s8  ;;  %p165_p4 = scmp.lt.s32.totalorder %s159_s8, %s159_s8 }
  0x2a   :  { %v81_v6 = vmul.f32 %v79_v4, %v79_v4  ;;  %v82_v7 = vmul.f32 %v80_v5, %v80_v5 }
  0x2b   :  { %p166_p5 = por %p165_p4, %p164_p3 }
  0x2c   :  { %v86_v8 = vadd.f32 %v82_v7, %v81_v6 }
  0x2d   :  { %p167_p6 = pnand %p166_p5, %p160_p2 }
  0x2e   :  { %88 = vst [vmem:[#allocation7] sm:$0xff] %v86_v8 }
  0x2f   :  { %170 = shalt.err (!%p167_p6)
}
  0x30   :  { %s171_s10 = scalar_lea.hbm %s245_s2, 128 }
  0x31   :  { %p172_p7 = scmp.ne.s32.totalorder %s245_s2, %s171_s10  ;;  %p175_p8 = scmp.lt.u32.totalorder %s171_s10, %s245_s2 }
  0x33   :  { %p177_p9 = pnand %p175_p8, %p172_p7 }
  0x35   :  { %180 = shalt.err (!%p177_p9)
}
  0x36   :  { %98 = dma.vmem_to_hbm [thread:$0]  %s96_s7, 128, %s245_s2, [#allocation4]  }
  0x37   :  { %185 = dma.done.wait [#allocation4], 128  }
  0x38   :  { %186 = vsyncadd [#allocation4], 4294967168 }
  0x39   :  { %102 = vsyncpa [#allocation3], 1 }
  0x3a   :  { %103 = vsyncpa [#allocation6], 1 }
  0x3b   :  { %104 = vsyncpa [#allocation4], 1 }

</bundles_post_ra>
